<compile_context>
chip_gen: v5e
topology: v5e:2x2
jax: 0.10.0
libtpu: 0.0.40
codegen_flags: <defaults>
</compile_context>

<pallas_src>
import functools

import numpy as np

import jax
import jax.numpy as jnp
from jax import lax
from jax.experimental import pallas as pl
from jax.experimental.pallas import tpu as pltpu


CONFIG = dict(
    imu_in_channels=4,
    wifi_in_channels=6,
    out_channels=32,       # hidden size D
    input_length=16,
    priors=16,             # prior count at the finest pyramid level
    head_num=2,            # pyramid levels (fused kernel specialized to 2)
    num_classes=5,
    embed_type='Norm',     # -> NoneEmbedding (identity)
)


def _round_up(x, m):
    return ((x + m - 1) // m) * m


def _head_width(num_classes):
    return _round_up(2 + num_classes, 8)


def _slab_layout(D, CIN):
    """Row offsets of the single packed f32 weight slab (lane width = 2*D)."""
    r_emb = 0                            # rows [0, 3*CIN): fused embedding weight
    r_gate = _round_up(3 * CIN, 8)       # rows [r_gate, r_gate+2D): gate (+ head)
    r_b = r_gate + 2 * D                 # rows [r_b, r_b+3D): backbone L0 | L1
    r_bias = r_b + 3 * D                 # 5 bias rows
    rows = _round_up(r_bias + 5, 8)
    return r_emb, r_gate, r_b, r_bias, rows


# ---------------------------------------------------------------------------
# Fused forward kernel (single pallas_call, single grid step, 2 input DMAs)
# ---------------------------------------------------------------------------

def _fused_kernel(x_ref, slab_ref, o_ref, h1_ref, *, B, L, D, CIN, K):
    f32 = jnp.float32
    BL = B * L
    Lh = L // 2
    T = L + Lh
    _, r_gate, r_b, r_bias, _ = _slab_layout(D, CIN)

    # ---- resident weights: ONE slab DMA, sliced at static offsets ---------
    w_emb = slab_ref[0:3 * CIN, :]                    # (3*CIN, 2D) block-diag [imu|wifi]
    w_gate = slab_ref[r_gate:r_gate + 2 * D, 0:D]     # (2D, D) = [Wa; Wb]
    w_head = slab_ref[r_gate:r_gate + D, D:D + K]     # (D, K)  = [loc | conf | pad]
    w_b0 = slab_ref[r_b:r_b + 3 * D, 0:D]             # (3D, D) backbone level 0
    w_b1 = slab_ref[r_b:r_b + 3 * D, D:2 * D]         # (3D, D) backbone level 1
    b_emb = slab_ref[r_bias + 0:r_bias + 1, :]        # (1, 2D) = [b_imu | b_wifi]
    b_gate = slab_ref[r_bias + 1:r_bias + 2, 0:D]
    b_b0 = slab_ref[r_bias + 2:r_bias + 3, 0:D]
    b_b1 = slab_ref[r_bias + 3:r_bias + 4, 0:D]
    b_head = slab_ref[r_bias + 4:r_bias + 5, 0:K]

    # ---- k=3 taps in registers: roll + per-batch boundary mask + lane concat
    ridx = lax.broadcasted_iota(jnp.int32, (BL, 1), 0)
    not_first = ridx != 0                              # rows where x[t-1] exists
    not_last = ridx != (L - 1)                         # rows where x[t+1] exists
    for b in range(1, B):
        not_first = jnp.logical_and(not_first, ridx != b * L)
        not_last = jnp.logical_and(not_last, ridx != (b * L + L - 1))

    def taps3(v):
        vl = jnp.where(not_first, pltpu.roll(v, 1, 0), 0.0)        # x[t-1], 0-padded
        vr = jnp.where(not_last, pltpu.roll(v, BL - 1, 0), 0.0)    # x[t+1], 0-padded
        return jnp.concatenate([vl, v, vr], axis=-1)               # (BL, 3*C)

    x = x_ref[...]                                                 # (BL, CIN)

    # ---- fused imu+wifi embedding conv (k=3, s=1, pad=1) + ReLU: 1 matmul --
    e = jnp.maximum(
        jnp.dot(taps3(x), w_emb, preferred_element_type=f32) + b_emb, 0.0)  # (BL, 2D)

    # ---- GatedFusion: g = sigmoid([e_i|e_w] @ [Wa;Wb] + bg): 1 matmul ------
    g = jax.nn.sigmoid(jnp.dot(e, w_gate, preferred_element_type=f32) + b_gate)
    xf = g * e[:, 0:D] + (1.0 - g) * e[:, D:2 * D]                 # (BL, D)

    # embed_type == 'Norm' -> NoneEmbedding (identity).

    # ---- backbone level 0: conv k=3 s=1 + ReLU ------------------------------
    h1 = jnp.maximum(
        jnp.dot(taps3(xf), w_b0, preferred_element_type=f32) + b_b0, 0.0)   # (BL, D)

    # ---- backbone level 1: conv k=3 s=2 + ReLU, even output rows only -------
    # Taps gathered with strided reads of h1 from VMEM scratch (no sel matmul).
    h1_ref[...] = h1
    c2 = h1_ref[pl.ds(0, B * Lh, stride=2), :]                     # h1[2t]
    r2 = h1_ref[pl.ds(1, B * Lh, stride=2), :]                     # h1[2t+1] (always in-bounds)
    ridx2 = lax.broadcasted_iota(jnp.int32, (B * Lh, 1), 0)
    nf2 = ridx2 != 0
    for b in range(1, B):
        nf2 = jnp.logical_and(nf2, ridx2 != b * Lh)
    l2 = jnp.where(nf2, pltpu.roll(r2, 1, 0), 0.0)                 # h1[2t-1], 0-padded
    win2 = jnp.concatenate([l2, c2, r2], axis=-1)                  # (B*Lh, 3D)
    h2 = jnp.maximum(
        jnp.dot(win2, w_b1, preferred_element_type=f32) + b_b1, 0.0)        # (B*Lh, D)

    # ---- fused loc|conf head for BOTH levels: 1 matmul ----------------------
    y = jnp.dot(jnp.concatenate([h1, h2], axis=0), w_head,
                preferred_element_type=f32) + b_head               # (B*(L+Lh), K)

    for b in range(B):                      # per-batch/level slabs into (B, T, K)
        o_ref[b, 0:L, :] = y[b * L:(b + 1) * L, :].astype(o_ref.dtype)
        o_ref[b, L:T, :] = y[BL + b * Lh:BL + (b + 1) * Lh, :].astype(o_ref.dtype)


def _call_fused(x_both, slab, *, B, L, D, CIN, K):
    BL = B * L
    T = L + L // 2
    kernel = functools.partial(_fused_kernel, B=B, L=L, D=D, CIN=CIN, K=K)
    return pl.pallas_call(
        kernel,
        out_shape=jax.ShapeDtypeStruct((B, T, K), jnp.float32),
        grid=(1,),
        in_specs=[pl.BlockSpec((BL, CIN), lambda i: (0, 0)),
                  pl.BlockSpec(slab.shape, lambda i: (0, 0))],
        out_specs=pl.BlockSpec((B, T, K), lambda i: (0, 0, 0)),
        scratch_shapes=[pltpu.VMEM((BL, D), jnp.float32)],   # h1 staging for strided reads
        compiler_params=pltpu.CompilerParams(
            dimension_semantics=("arbitrary",)),
    )(x_both, slab)


# ---------------------------------------------------------------------------
# Parameters / one-time weight packing / priors / public forward
# ---------------------------------------------------------------------------

def init_params(key, cfg):
    D = cfg['out_channels']
    ks = jax.random.split(key, 12)

    def conv_w(k, cin, cout):
        return 0.2 * jax.random.normal(k, (3, cin, cout), jnp.float32)

    def lin_w(k, din, dout):
        return 0.2 * jax.random.normal(k, (din, dout), jnp.float32)

    return {
        'emb_imu_w': conv_w(ks[0], cfg['imu_in_channels'], D),
        'emb_imu_b': jnp.zeros((1, D), jnp.float32),
        'emb_wifi_w': conv_w(ks[1], cfg['wifi_in_channels'], D),
        'emb_wifi_b': jnp.zeros((1, D), jnp.float32),
        'fuse_wa': lin_w(ks[2], D, D),
        'fuse_wb': lin_w(ks[3], D, D),
        'fuse_bg': jnp.zeros((1, D), jnp.float32),
        'backbone_w': [conv_w(ks[4 + i], D, D) for i in range(cfg['head_num'])],
        'backbone_b': [jnp.zeros((1, D), jnp.float32) for _ in range(cfg['head_num'])],
        'loc_w': lin_w(ks[8], D, 2),
        'loc_b': jnp.zeros((1, 2), jnp.float32),
        'conf_w': lin_w(ks[9], D, cfg['num_classes']),
        'conf_b': jnp.zeros((1, cfg['num_classes']), jnp.float32),
    }


def make_priors(cfg):
    t = cfg['priors']
    pieces = []
    for _ in range(cfg['head_num']):
        pieces.append(((jnp.arange(t, dtype=jnp.float32) + 0.5) / t).reshape(-1, 1))
        t = t // 2
    return jnp.concatenate(pieces, axis=0)[None, :, :]   # (1, T_total, 1)


def pack_params(params, cfg):
    """One-time packing of every weight/bias into a single f32 slab (one DMA)."""
    D = cfg['out_channels']
    Ci = cfg['imu_in_channels']
    Cw = cfg['wifi_in_channels']
    nc = cfg['num_classes']
    CIN = Ci + Cw
    K = _head_width(nc)
    assert K <= D
    _, r_gate, r_b, r_bias, rows = _slab_layout(D, CIN)

    slab = np.zeros((rows, 2 * D), np.float32)

    # fused block-diagonal embedding weight: window order [left | center | right],
    # each tap ordered [imu channels | wifi channels].
    w_ei = np.asarray(params['emb_imu_w'])                 # (3, Ci, D)
    w_ew = np.asarray(params['emb_wifi_w'])                # (3, Cw, D)
    for k in range(3):
        r0 = k * CIN
        slab[r0:r0 + Ci, 0:D] = w_ei[k]
        slab[r0 + Ci:r0 + CIN, D:2 * D] = w_ew[k]

    # gated fusion [Wa; Wb] and (lane-packed beside it) the fused loc|conf head.
    slab[r_gate:r_gate + D, 0:D] = np.asarray(params['fuse_wa'])
    slab[r_gate + D:r_gate + 2 * D, 0:D] = np.asarray(params['fuse_wb'])
    w_head = np.concatenate([np.asarray(params['loc_w']),
                             np.asarray(params['conf_w'])], axis=1)   # (D, 2+nc)
    slab[r_gate:r_gate + D, D:D + w_head.shape[1]] = w_head

    # backbone levels 0 / 1 side by side.
    slab[r_b:r_b + 3 * D, 0:D] = np.asarray(params['backbone_w'][0]).reshape(3 * D, D)
    slab[r_b:r_b + 3 * D, D:2 * D] = np.asarray(params['backbone_w'][1]).reshape(3 * D, D)

    # biases.
    slab[r_bias + 0, 0:D] = np.asarray(params['emb_imu_b']).reshape(D)
    slab[r_bias + 0, D:2 * D] = np.asarray(params['emb_wifi_b']).reshape(D)
    slab[r_bias + 1, 0:D] = np.asarray(params['fuse_bg']).reshape(D)
    slab[r_bias + 2, 0:D] = np.asarray(params['backbone_b'][0]).reshape(D)
    slab[r_bias + 3, 0:D] = np.asarray(params['backbone_b'][1]).reshape(D)
    b_head = np.concatenate([np.asarray(params['loc_b']).reshape(-1),
                             np.asarray(params['conf_b']).reshape(-1)])
    slab[r_bias + 4, 0:b_head.shape[0]] = b_head

    return {'slab': jnp.asarray(slab), 'priors': make_priors(cfg)}


@jax.jit
def tad_muti_pre_forward(packed, x_imu_ncl, x_wifi_ncl):
    """x_imu_ncl: (B, C_imu, L), x_wifi_ncl: (B, C_wifi, L)  (PyTorch NCL)."""
    cfg = CONFIG
    nc = cfg['num_classes']
    D = cfg['out_channels']
    assert cfg['head_num'] == 2   # TODO(synk): kernel specialized to 2 pyramid levels
    B, Ci, L = x_imu_ncl.shape
    Cw = x_wifi_ncl.shape[1]
    K = _head_width(nc)

    # NCL -> one channels-last (B*L, Ci+Cw) slab (one concat + one tiny transpose;
    # kept in the wrapper since time must move to the sublane axis regardless).
    x_both = jnp.transpose(
        jnp.concatenate([x_imu_ncl, x_wifi_ncl], axis=1), (0, 2, 1)
    ).reshape(B * L, Ci + Cw)

    out = _call_fused(x_both, packed['slab'], B=B, L=L, D=D, CIN=Ci + Cw, K=K)

    loc = out[:, :, 0:2]
    conf = out[:, :, 2:2 + nc]
    return {'loc': loc, 'conf': conf, 'priors': packed['priors']}


# ---------------------------------------------------------------------------
# Pure-JAX reference (same structure) for a numerical sanity check
# ---------------------------------------------------------------------------

def _forward_reference(params, x_imu_ncl, x_wifi_ncl, cfg):
    hi = jax.lax.Precision.HIGHEST

    def conv3(x, w3, bias, stride=1):
        L = x.shape[1]
        xp = jnp.pad(x, ((0, 0), (1, 1), (0, 0)))
        y = sum(jnp.einsum('blc,cd->bld', xp[:, k:k + L], w3[k], precision=hi)
                for k in range(3)) + bias
        return y[:, ::stride]

    x_imu = jnp.transpose(x_imu_ncl, (0, 2, 1))
    x_wifi = jnp.transpose(x_wifi_ncl, (0, 2, 1))
    e_i = jax.nn.relu(conv3(x_imu, params['emb_imu_w'], params['emb_imu_b']))
    e_w = jax.nn.relu(conv3(x_wifi, params['emb_wifi_w'], params['emb_wifi_b']))
    g = jax.nn.sigmoid(
        jnp.einsum('bld,de->ble', e_i, params['fuse_wa'], precision=hi)
        + jnp.einsum('bld,de->ble', e_w, params['fuse_wb'], precision=hi)
        + params['fuse_bg'])
    x = g * e_i + (1.0 - g) * e_w
    feats, h = [], x
    for i in range(cfg['head_num']):
        s = 1 if i == 0 else 2
        h = jax.nn.relu(conv3(h, params['backbone_w'][i],
                              params['backbone_b'][i], stride=s))
        feats.append(h)
    loc = jnp.concatenate(
        [jnp.einsum('bld,dk->blk', f, params['loc_w'], precision=hi)
         + params['loc_b'] for f in feats], axis=1)
    conf = jnp.concatenate(
        [jnp.einsum('bld,dk->blk', f, params['conf_w'], precision=hi)
         + params['conf_b'] for f in feats], axis=1)
    return loc, conf


# ---------------------------------------------------------------------------

if __name__ == "__main__":
    cfg = CONFIG
    key = jax.random.PRNGKey(0)
    k_p, k_i, k_w = jax.random.split(key, 3)

    params = init_params(k_p, cfg)
    packed = pack_params(params, cfg)      # one-time weight packing (outside jit)

    B, L = 2, cfg['input_length']
    x_imu = jax.random.normal(k_i, (B, cfg['imu_in_channels'], L), jnp.float32)
    x_wifi = jax.random.normal(k_w, (B, cfg['wifi_in_channels'], L), jnp.float32)

    out = tad_muti_pre_forward(packed, x_imu, x_wifi)
    out = jax.block_until_ready(out)

    # shape sanity: total priors = 16 + 8 = 24
    assert out['loc'].shape == (B, 24, 2), out['loc'].shape
    assert out['conf'].shape == (B, 24, cfg['num_classes']), out['conf'].shape
    assert out['priors'].shape == (1, 24, 1), out['priors'].shape

    # numerical sanity vs a pure-JAX reference of the same structure
    loc_ref, conf_ref = _forward_reference(params, x_imu, x_wifi, cfg)
    assert jnp.allclose(out['loc'], loc_ref, rtol=3e-2, atol=3e-2), "loc mismatch"
    assert jnp.allclose(out['conf'], conf_ref, rtol=3e-2, atol=3e-2), "conf mismatch"

    print("KERNEL_OK")
</pallas_src>

<mosaic_0001>
module attributes {stable_mosaic.version = 11 : i64} {
  func.func @_fused_kernel(%arg0: i32, %arg1: memref<32x10xf32, #tpu.memory_space<vmem>>, %arg2: memref<200x64xf32, #tpu.memory_space<vmem>>, %arg3: memref<2x24x8xf32, #tpu.memory_space<vmem>>, %arg4: memref<32x32xf32, #tpu.memory_space<vmem>>) attributes {dimension_semantics = [#tpu.dimension_semantics<arbitrary>], iteration_bounds = array<i64: 1>, scalar_prefetch = 0 : i64, scratch_operands = 1 : i64, tpu.core_type = #tpu.core_type<tc>, window_params = [{pipeline_mode = #tpu.pipeline_mode<synchronous>, transform_indices = @transform_0, window_bounds = array<i64: 32, 10>}, {pipeline_mode = #tpu.pipeline_mode<synchronous>, transform_indices = @transform_1, window_bounds = array<i64: 200, 64>}, {pipeline_mode = #tpu.pipeline_mode<synchronous>, transform_indices = @transform_2, window_bounds = array<i64: 2, 24, 8>}]} {
    %c0 = arith.constant 0 : index
    %c0_0 = arith.constant 0 : index
    %0 = vector.load %arg2[%c0, %c0_0] : memref<200x64xf32, #tpu.memory_space<vmem>>, vector<30x64xf32>
    %c32 = arith.constant 32 : index
    %c0_1 = arith.constant 0 : index
    %1 = vector.load %arg2[%c32, %c0_1] : memref<200x64xf32, #tpu.memory_space<vmem>>, vector<64x32xf32>
    %c32_2 = arith.constant 32 : index
    %c32_3 = arith.constant 32 : index
    %2 = vector.load %arg2[%c32_2, %c32_3] : memref<200x64xf32, #tpu.memory_space<vmem>>, vector<32x8xf32>
    %c96 = arith.constant 96 : index
    %c0_4 = arith.constant 0 : index
    %3 = vector.load %arg2[%c96, %c0_4] : memref<200x64xf32, #tpu.memory_space<vmem>>, vector<96x32xf32>
    %c96_5 = arith.constant 96 : index
    %c32_6 = arith.constant 32 : index
    %4 = vector.load %arg2[%c96_5, %c32_6] : memref<200x64xf32, #tpu.memory_space<vmem>>, vector<96x32xf32>
    %c192 = arith.constant 192 : index
    %c0_7 = arith.constant 0 : index
    %5 = vector.load %arg2[%c192, %c0_7] : memref<200x64xf32, #tpu.memory_space<vmem>>, vector<1x64xf32>
    %c193 = arith.constant 193 : index
    %c0_8 = arith.constant 0 : index
    %6 = vector.load %arg2[%c193, %c0_8] : memref<200x64xf32, #tpu.memory_space<vmem>>, vector<1x32xf32>
    %c194 = arith.constant 194 : index
    %c0_9 = arith.constant 0 : index
    %7 = vector.load %arg2[%c194, %c0_9] : memref<200x64xf32, #tpu.memory_space<vmem>>, vector<1x32xf32>
    %c195 = arith.constant 195 : index
    %c0_10 = arith.constant 0 : index
    %8 = vector.load %arg2[%c195, %c0_10] : memref<200x64xf32, #tpu.memory_space<vmem>>, vector<1x32xf32>
    %c196 = arith.constant 196 : index
    %c0_11 = arith.constant 0 : index
    %9 = vector.load %arg2[%c196, %c0_11] : memref<200x64xf32, #tpu.memory_space<vmem>>, vector<1x8xf32>
    %10 = tpu.iota {dimensions = array<i32: 0>} : vector<32x1xi32>
    %c0_i32 = arith.constant 0 : i32
    %11 = vector.broadcast %c0_i32 : i32 to vector<32x1xi32>
    %12 = arith.cmpi ne, %10, %11 : vector<32x1xi32>
    %c15_i32 = arith.constant 15 : i32
    %13 = vector.broadcast %c15_i32 : i32 to vector<32x1xi32>
    %14 = arith.cmpi ne, %10, %13 : vector<32x1xi32>
    %c16_i32 = arith.constant 16 : i32
    %15 = vector.broadcast %c16_i32 : i32 to vector<32x1xi32>
    %16 = arith.cmpi ne, %10, %15 : vector<32x1xi32>
    %17 = arith.andi %12, %16 : vector<32x1xi1>
    %c31_i32 = arith.constant 31 : i32
    %18 = vector.broadcast %c31_i32 : i32 to vector<32x1xi32>
    %19 = arith.cmpi ne, %10, %18 : vector<32x1xi32>
    %20 = arith.andi %14, %19 : vector<32x1xi1>
    %c0_12 = arith.constant 0 : index
    %c0_13 = arith.constant 0 : index
    %21 = vector.load %arg1[%c0_12, %c0_13] : memref<32x10xf32, #tpu.memory_space<vmem>>, vector<32x10xf32>
    %c1_i32 = arith.constant 1 : i32
    %22 = tpu.dynamic_rotate %21 by %c1_i32 dim 0 : vector<32x10xf32>, i32 -> vector<32x10xf32>
    %cst = arith.constant 0.000000e+00 : f32
    %23 = vector.shape_cast %17 : vector<32x1xi1> to vector<32x1xi1>
    %24 = vector.broadcast %23 : vector<32x1xi1> to vector<32x10xi1>
    %25 = vector.broadcast %cst : f32 to vector<32x10xf32>
    %26 = arith.select %24, %22, %25 : vector<32x10xi1>, vector<32x10xf32>
    %c31_i32_14 = arith.constant 31 : i32
    %27 = tpu.dynamic_rotate %21 by %c31_i32_14 dim 0 : vector<32x10xf32>, i32 -> vector<32x10xf32>
    %cst_15 = arith.constant 0.000000e+00 : f32
    %28 = vector.shape_cast %20 : vector<32x1xi1> to vector<32x1xi1>
    %29 = vector.broadcast %28 : vector<32x1xi1> to vector<32x10xi1>
    %30 = vector.broadcast %cst_15 : f32 to vector<32x10xf32>
    %31 = arith.select %29, %27, %30 : vector<32x10xi1>, vector<32x10xf32>
    %32 = tpu.concatenate %26, %21, %31 in 1 : vector<32x10xf32>, vector<32x10xf32>, vector<32x10xf32> -> vector<32x30xf32>
    %cst_16 = arith.constant dense<0.000000e+00> : vector<32x64xf32>
    %33 = tpu.matmul %32, %0, %cst_16 {dimension_numbers = #tpu.dot_dimension_numbers<[1], [0], [0], [1], [0, 0, 1, 1], [], []>} : vector<32x30xf32>, vector<30x64xf32>, vector<32x64xf32> -> vector<32x64xf32>
    %34 = vector.broadcast %5 : vector<1x64xf32> to vector<32x64xf32>
    %35 = arith.addf %33, %34 : vector<32x64xf32>
    %cst_17 = arith.constant 0.000000e+00 : f32
    %36 = vector.broadcast %cst_17 : f32 to vector<32x64xf32>
    %37 = arith.maximumf %35, %36 : vector<32x64xf32>
    %cst_18 = arith.constant dense<0.000000e+00> : vector<32x32xf32>
    %38 = tpu.matmul %37, %1, %cst_18 {dimension_numbers = #tpu.dot_dimension_numbers<[1], [0], [0], [1], [0, 0, 1, 1], [], []>} : vector<32x64xf32>, vector<64x32xf32>, vector<32x32xf32> -> vector<32x32xf32>
    %39 = vector.broadcast %6 : vector<1x32xf32> to vector<32x32xf32>
    %40 = arith.addf %38, %39 : vector<32x32xf32>
    %41 = arith.negf %40 : vector<32x32xf32>
    %42 = math.exp %41 : vector<32x32xf32>
    %cst_19 = arith.constant 1.000000e+00 : f32
    %43 = vector.broadcast %cst_19 : f32 to vector<32x32xf32>
    %44 = arith.addf %43, %42 : vector<32x32xf32>
    %45 = arith.divf %43, %44 : vector<32x32xf32>
    %46 = vector.extract_strided_slice %37 {offsets = [0, 0], sizes = [32, 32], strides = [1, 1]} : vector<32x64xf32> to vector<32x32xf32>
    %47 = arith.mulf %45, %46 : vector<32x32xf32>
    %cst_20 = arith.constant 1.000000e+00 : f32
    %48 = vector.broadcast %cst_20 : f32 to vector<32x32xf32>
    %49 = arith.subf %48, %45 : vector<32x32xf32>
    %50 = vector.extract_strided_slice %37 {offsets = [0, 32], sizes = [32, 32], strides = [1, 1]} : vector<32x64xf32> to vector<32x32xf32>
    %51 = arith.mulf %49, %50 : vector<32x32xf32>
    %52 = arith.addf %47, %51 : vector<32x32xf32>
    %c1_i32_21 = arith.constant 1 : i32
    %53 = tpu.dynamic_rotate %52 by %c1_i32_21 dim 0 : vector<32x32xf32>, i32 -> vector<32x32xf32>
    %cst_22 = arith.constant 0.000000e+00 : f32
    %54 = vector.shape_cast %17 : vector<32x1xi1> to vector<32x1xi1>
    %55 = vector.broadcast %54 : vector<32x1xi1> to vector<32x32xi1>
    %56 = vector.broadcast %cst_22 : f32 to vector<32x32xf32>
    %57 = arith.select %55, %53, %56 : vector<32x32xi1>, vector<32x32xf32>
    %c31_i32_23 = arith.constant 31 : i32
    %58 = tpu.dynamic_rotate %52 by %c31_i32_23 dim 0 : vector<32x32xf32>, i32 -> vector<32x32xf32>
    %cst_24 = arith.constant 0.000000e+00 : f32
    %59 = vector.shape_cast %20 : vector<32x1xi1> to vector<32x1xi1>
    %60 = vector.broadcast %59 : vector<32x1xi1> to vector<32x32xi1>
    %61 = vector.broadcast %cst_24 : f32 to vector<32x32xf32>
    %62 = arith.select %60, %58, %61 : vector<32x32xi1>, vector<32x32xf32>
    %63 = tpu.concatenate %57, %52, %62 in 1 : vector<32x32xf32>, vector<32x32xf32>, vector<32x32xf32> -> vector<32x96xf32>
    %cst_25 = arith.constant dense<0.000000e+00> : vector<32x32xf32>
    %64 = tpu.matmul %63, %3, %cst_25 {dimension_numbers = #tpu.dot_dimension_numbers<[1], [0], [0], [1], [0, 0, 1, 1], [], []>} : vector<32x96xf32>, vector<96x32xf32>, vector<32x32xf32> -> vector<32x32xf32>
    %65 = vector.broadcast %7 : vector<1x32xf32> to vector<32x32xf32>
    %66 = arith.addf %64, %65 : vector<32x32xf32>
    %cst_26 = arith.constant 0.000000e+00 : f32
    %67 = vector.broadcast %cst_26 : f32 to vector<32x32xf32>
    %68 = arith.maximumf %66, %67 : vector<32x32xf32>
    %c0_27 = arith.constant 0 : index
    %c0_28 = arith.constant 0 : index
    %69 = vector.load %arg4[%c0_27, %c0_28] : memref<32x32xf32, #tpu.memory_space<vmem>>, vector<32x32xf32>
    tpu.vector_store %arg4[%c0_27, %c0_28], %68 {strides = array<i32>} : memref<32x32xf32, #tpu.memory_space<vmem>>, vector<32x32xf32>,
    %c0_29 = arith.constant 0 : index
    %c0_30 = arith.constant 0 : index
    %70 = tpu.strided_load %arg4[%c0_29, %c0_30] {strides = array<i32: 2, 1>} : memref<32x32xf32, #tpu.memory_space<vmem>>, vector<16x32xf32>
    %c1 = arith.constant 1 : index
    %c0_31 = arith.constant 0 : index
    %71 = tpu.strided_load %arg4[%c1, %c0_31] {strides = array<i32: 2, 1>} : memref<32x32xf32, #tpu.memory_space<vmem>>, vector<16x32xf32>
    %72 = tpu.iota {dimensions = array<i32: 0>} : vector<16x1xi32>
    %c0_i32_32 = arith.constant 0 : i32
    %73 = vector.broadcast %c0_i32_32 : i32 to vector<16x1xi32>
    %74 = arith.cmpi ne, %72, %73 : vector<16x1xi32>
    %c8_i32 = arith.constant 8 : i32
    %75 = vector.broadcast %c8_i32 : i32 to vector<16x1xi32>
    %76 = arith.cmpi ne, %72, %75 : vector<16x1xi32>
    %77 = arith.andi %74, %76 : vector<16x1xi1>
    %c1_i32_33 = arith.constant 1 : i32
    %78 = tpu.dynamic_rotate %71 by %c1_i32_33 dim 0 : vector<16x32xf32>, i32 -> vector<16x32xf32>
    %cst_34 = arith.constant 0.000000e+00 : f32
    %79 = vector.shape_cast %77 : vector<16x1xi1> to vector<16x1xi1>
    %80 = vector.broadcast %79 : vector<16x1xi1> to vector<16x32xi1>
    %81 = vector.broadcast %cst_34 : f32 to vector<16x32xf32>
    %82 = arith.select %80, %78, %81 : vector<16x32xi1>, vector<16x32xf32>
    %83 = tpu.concatenate %82, %70, %71 in 1 : vector<16x32xf32>, vector<16x32xf32>, vector<16x32xf32> -> vector<16x96xf32>
    %cst_35 = arith.constant dense<0.000000e+00> : vector<16x32xf32>
    %84 = tpu.matmul %83, %4, %cst_35 {dimension_numbers = #tpu.dot_dimension_numbers<[1], [0], [0], [1], [0, 0, 1, 1], [], []>} : vector<16x96xf32>, vector<96x32xf32>, vector<16x32xf32> -> vector<16x32xf32>
    %85 = vector.broadcast %8 : vector<1x32xf32> to vector<16x32xf32>
    %86 = arith.addf %84, %85 : vector<16x32xf32>
    %cst_36 = arith.constant 0.000000e+00 : f32
    %87 = vector.broadcast %cst_36 : f32 to vector<16x32xf32>
    %88 = arith.maximumf %86, %87 : vector<16x32xf32>
    %89 = tpu.concatenate %68, %88 in 0 : vector<32x32xf32>, vector<16x32xf32> -> vector<48x32xf32>
    %cst_37 = arith.constant dense<0.000000e+00> : vector<48x8xf32>
    %90 = tpu.matmul %89, %2, %cst_37 {dimension_numbers = #tpu.dot_dimension_numbers<[1], [0], [0], [1], [0, 0, 1, 1], [], []>} : vector<48x32xf32>, vector<32x8xf32>, vector<48x8xf32> -> vector<48x8xf32>
    %91 = vector.broadcast %9 : vector<1x8xf32> to vector<48x8xf32>
    %92 = arith.addf %90, %91 : vector<48x8xf32>
    %93 = vector.extract_strided_slice %92 {offsets = [0, 0], sizes = [16, 8], strides = [1, 1]} : vector<48x8xf32> to vector<16x8xf32>
    %c0_38 = arith.constant 0 : index
    %c0_39 = arith.constant 0 : index
    %c0_40 = arith.constant 0 : index
    %94 = vector.load %arg3[%c0_38, %c0_39, %c0_40] : memref<2x24x8xf32, #tpu.memory_space<vmem>>, vector<1x16x8xf32>
    %95 = vector.shape_cast %94 : vector<1x16x8xf32> to vector<16x8xf32>
    %96 = vector.shape_cast %93 : vector<16x8xf32> to vector<1x16x8xf32>
    tpu.vector_store %arg3[%c0_38, %c0_39, %c0_40], %96 {strides = array<i32>} : memref<2x24x8xf32, #tpu.memory_space<vmem>>, vector<1x16x8xf32>,
    %97 = vector.extract_strided_slice %92 {offsets = [32, 0], sizes = [8, 8], strides = [1, 1]} : vector<48x8xf32> to vector<8x8xf32>
    %c0_41 = arith.constant 0 : index
    %c16 = arith.constant 16 : index
    %c0_42 = arith.constant 0 : index
    %98 = vector.load %arg3[%c0_41, %c16, %c0_42] : memref<2x24x8xf32, #tpu.memory_space<vmem>>, vector<1x8x8xf32>
    %99 = vector.shape_cast %98 : vector<1x8x8xf32> to vector<8x8xf32>
    %100 = vector.shape_cast %97 : vector<8x8xf32> to vector<1x8x8xf32>
    tpu.vector_store %arg3[%c0_41, %c16, %c0_42], %100 {strides = array<i32>} : memref<2x24x8xf32, #tpu.memory_space<vmem>>, vector<1x8x8xf32>,
    %101 = vector.extract_strided_slice %92 {offsets = [16, 0], sizes = [16, 8], strides = [1, 1]} : vector<48x8xf32> to vector<16x8xf32>
    %c1_43 = arith.constant 1 : index
    %c0_44 = arith.constant 0 : index
    %c0_45 = arith.constant 0 : index
    %102 = vector.load %arg3[%c1_43, %c0_44, %c0_45] : memref<2x24x8xf32, #tpu.memory_space<vmem>>, vector<1x16x8xf32>
    %103 = vector.shape_cast %102 : vector<1x16x8xf32> to vector<16x8xf32>
    %104 = vector.shape_cast %101 : vector<16x8xf32> to vector<1x16x8xf32>
    tpu.vector_store %arg3[%c1_43, %c0_44, %c0_45], %104 {strides = array<i32>} : memref<2x24x8xf32, #tpu.memory_space<vmem>>, vector<1x16x8xf32>,
    %105 = vector.extract_strided_slice %92 {offsets = [40, 0], sizes = [8, 8], strides = [1, 1]} : vector<48x8xf32> to vector<8x8xf32>
    %c1_46 = arith.constant 1 : index
    %c16_47 = arith.constant 16 : index
    %c0_48 = arith.constant 0 : index
    %106 = vector.load %arg3[%c1_46, %c16_47, %c0_48] : memref<2x24x8xf32, #tpu.memory_space<vmem>>, vector<1x8x8xf32>
    %107 = vector.shape_cast %106 : vector<1x8x8xf32> to vector<8x8xf32>
    %108 = vector.shape_cast %105 : vector<8x8xf32> to vector<1x8x8xf32>
    tpu.vector_store %arg3[%c1_46, %c16_47, %c0_48], %108 {strides = array<i32>} : memref<2x24x8xf32, #tpu.memory_space<vmem>>, vector<1x8x8xf32>,
    return
  }
  func.func @transform_0(%arg0: i32) -> (i32, i32) {
    %c0_i32 = arith.constant 0 : i32
    %c0_i32_0 = arith.constant 0 : i32
    %c0_i32_1 = arith.constant 0 : i32
    return %c0_i32, %c0_i32_0 : i32, i32
  }
  func.func @transform_1(%arg0: i32) -> (i32, i32) {
    %c0_i32 = arith.constant 0 : i32
    %c0_i32_0 = arith.constant 0 : i32
    %c0_i32_1 = arith.constant 0 : i32
    return %c0_i32, %c0_i32_0 : i32, i32
  }
  func.func @transform_2(%arg0: i32) -> (i32, i32, i32) {
    %c0_i32 = arith.constant 0 : i32
    %c0_i32_0 = arith.constant 0 : i32
    %c0_i32_1 = arith.constant 0 : i32
    %c0_i32_2 = arith.constant 0 : i32
    return %c0_i32, %c0_i32_0, %c0_i32_1 : i32, i32, i32
  }
}

</mosaic_0001>

<bundles_post_ra>
// kernel: tad_muti_pre_forward.1
= control target key start
LH: loop header
LB: loop body
LE: loop exit
PB: predicated region body
PF: predicated region fallthrough
CT: control target
= control target key end

     0   :  { %v40_v0 = vlaneseq  ;;  %s768_s15 = smov 10   ;;  %vm171_vm4 = vcmask 1045504   ;;  %vm147_vm6 = vcmask 80896   ;;  %vm152_vm7 = vcmask 162816   ;;  %s770_s16 = smov 96   ;;  %s1148_s0 = inlined_call_operand.vmem [shape: f32[32,10], index: 0, kind: input, shape index: {}]   ;;  %s1149_s1 = inlined_call_operand.vmem [shape: f32[200,64], index: 1, kind: input, shape index: {}]   ;;  %s1150_s2 = inlined_call_operand.vmem [shape: f32[2,24,8], index: 2, kind: output, shape index: {}]  }
   0x1   :  { %v69_v1 = vld [vmem:[%s1148_s0] sm:$0xff]  ;;  %v794_v2 = vld [vmem:[%s1148_s0 + $0x8] sm:$0xff]  ;;  %v799_v3 = vld [vmem:[%s1148_s0 + $0x10] sm:$0xff]  ;;  %vm158_vm8 = vcmask 244736   ;;  %vm209_vm10 = vcmask 523264   ;;  %s771_s18 = smov 32  }
   0x2   :  { %119 = vrot.lane.b32.xlu0 %v69_v1, %s768_s15  ;;  %121 = vrot.lane.b32.xlu1 %v794_v2, %s768_s15  ;;  %v95_v4 = vrot.slane %v794_v2, 1  ;;  %v94_v5 = vrot.slane %v69_v1, 1  ;;  %v803_v6 = vshrl.u32 %v40_v0, 7  ;;  %v96_v7 = vrot.slane %v799_v3, 1  ;;  %v809_v8 = vld [vmem:[%s1148_s0 + $0x18] sm:$0xff]  ;;  %s769_s0 = smov 20  }
   0x3   :  { %123 = vrot.lane.b32.xlu2 %v799_v3, %s768_s15  ;;  %v97_v11 = vrot.slane %v809_v8, 1  ;;  %v73_v18 = vrot.slane %v69_v1, 7  ;;  %v76_v19 = vrot.slane %v809_v8, 7  ;;  %v74_v20 = vrot.slane %v794_v2, 7  ;;  %v14_v23 = vld [vmem:[%s1149_s1 + $0x18] sm:$0x3f] }
   0x4   :  { %vm98_vm0 = vcmp.lt.s32.totalorder %v803_v6, 7  ;;  %v814_v9 = vadd.s32 8, %v803_v6  ;;  %v825_v14 = vadd.s32 24, %v803_v6  ;;  %vm77_vm3 = vcmp.lt.s32.totalorder %v803_v6, 1  ;;  %v13_v24 = vld [vmem:[%s1149_s1 + $0x10] sm:$0xff]  ;;  %674 = vmatpush.msk.msra.mxu3 %vm171_vm4, %v14_v23  ;;  %v12_v25 = vld [vmem:[%s1149_s1 + $0x8] sm:$0xff] }
   0x5   :  { %v100_v10 = vsel %vm98_vm0, %v95_v4, %v96_v7  ;;  %v101_v12 = vsel %vm98_vm0, %v94_v5, %v95_v4  ;;  %v99_v15 = vsel %vm98_vm0, %v96_v7, %v97_v11  ;;  %v102_v16 = vsel %vm98_vm0, %v97_v11, %v94_v5  ;;  %v11_v26 = vld [vmem:[%s1149_s1] sm:$0xff]  ;;  %v22_v28 = vld [vmem:[%s1149_s1 + $0x58] sm:$0xff]  ;;  %v21_v29 = vld [vmem:[%s1149_s1 + $0x50] sm:$0xff]  ;;  %s772_s19 = smov 64  }
   0x6   :  { %vm50_vm1 = vcmp.ne.s32.totalorder %v814_v9, 15  ;;  %vm64_vm2 = vcmp.ne.s32.totalorder %v825_v14, 31  ;;  %v81_v21 = vsel %vm77_vm3, %v76_v19, %v73_v18  ;;  %v80_v22 = vsel %vm77_vm3, %v73_v18, %v74_v20  ;;  %188 = vmatpush.msra.mxu3 %v13_v24  ;;  %230 = vmatpush.msra.mxu1 %v22_v28  ;;  %v20_v31 = vld [vmem:[%s1149_s1 + $0x48] sm:$0xff]  ;;  %v19_v33 = vld [vmem:[%s1149_s1 + $0x40] sm:$0xff]  ;;  %v873_v36 = vld [vmem:[%s1149_s1 + $0x38] sm:$0xff] }
   0x7   :  { %v112_v13 = vsel %vm50_vm1, %v100_v10, 0.0  ;;  %v114_v17 = vsel %vm64_vm2, %v102_v16, 0.0  ;;  %vm45_vm5 = vcmp.ne.s32.totalorder %v803_v6, 0  ;;  %v879_v38 = vadd.s32 16, %v803_v6  ;;  %v901_v54 = vld [vmem:[%s1149_s1 + $0x30] sm:$0xff]  ;;  %v907_v55 = vld [vmem:[%s1149_s1 + $0x28] sm:$0xff] }
   0x8   :  { %189 = vmatpush.msra.mxu3 %v12_v25  ;;  %v90_v32 = vsel %vm45_vm5, %v81_v21, 0.0  ;;  %231 = vmatpush.msra.mxu1 %v21_v29  ;;  %v75_v40 = vrot.slane %v799_v3, 7  ;;  %v913_v56 = vld [vmem:[%s1149_s1 + $0x20] sm:$0xff] }
   0x9   :  { %vm55_vm9 = vcmp.ne.s32.totalorder %v879_v38, 16  ;;  %v742_v57 = vpack.i.bf16 %v913_v56, %v907_v55  ;;  %v747_v58 = vld [vmem:[%s1149_s1 + $0xc0] ss:$0 sm:$0xff]  ;;  %v749_v38 = vld [vmem:[%s1149_s1 + $0xc2] ss:$0 sm:$0xff] }
   0xa   :  { %135 = vrot.lane.b32.xlu0 %v101_v12, %s769_s0  ;;  %137 = vrot.lane.b32.xlu1 %v112_v13, %s769_s0  ;;  %v79_v43 = vsel %vm77_vm3, %v74_v20, %v75_v40  ;;  %v78_v49 = vsel %vm77_vm3, %v75_v40, %v76_v19  ;;  %v31_v14 = vld [vmem:[%s1149_s1 + $0xa0] sm:$0xff] }
   0xb   :  { %139 = vrot.lane.b32.xlu2 %v99_v15, %s769_s0  ;;  %190 = vmatpush.msra.mxu3 %v11_v26  ;;  %v92_v45 = vsel %vm55_vm9, %v79_v43, 0.0 }
   0xc   :  { %232 = vmatpush.msra.mxu1 %v20_v31 }
   0xe   :  { %233 = vmatpush.msra.mxu1 %v19_v33 }
  0x10   :  { %234 = vmatpush.msra.mxu1 %v873_v36 }
  0x12   :  { %125 = vrot.lane.b32.xlu0 %v809_v8, %s768_s15  ;;  %141 = vrot.lane.b32.xlu1 %v114_v17, %s769_s0  ;;  %v748_v8 = vld [vmem:[%s1149_s1 + $0xc1] ss:$0 sm:$0xff] }
  0x13   :  { %235 = vmatpush.msra.mxu1 %v901_v54 }
  0x15   :  { %236 = vmatpush.msra.mxu1 %v907_v55 }
  0x17   :  { %237 = vmatpush.msra.mxu1 %v913_v56 }
  0x5d   :  { %v124_v39 = vpop.permute.xlu2 %123 }
  0x5e   :  { %v150_v46 = vsel %vm147_vm6, %v92_v45, %v124_v39 }
  0x65   :  { %v140_v47 = vpop.permute.xlu2 %139 }
  0x66   :  { %v155_v48 = vsel %vm152_vm7, %v150_v46, %v140_v47 }
  0x74   :  { %v120_v27 = vpop.permute.xlu0 %119  ;;  %v122_v30 = vpop.permute.xlu1 %121 }
  0x75   :  { %v148_v34 = vsel %vm147_vm6, %v90_v32, %v120_v27  ;;  %v149_v41 = vsel %vm147_vm6, %v80_v22, %v122_v30 }
  0x7c   :  { %v136_v35 = vpop.permute.xlu0 %135  ;;  %v138_v42 = vpop.permute.xlu1 %137 }
  0x7d   :  { %v153_v37 = vsel %vm152_vm7, %v148_v34, %v136_v35  ;;  %v154_v44 = vsel %vm152_vm7, %v149_v41, %v138_v42 }
  0x7e   :  { %675 = vmatmul.msk.f32.vlgmr.msra.gmra.mxu3 %vm158_vm8, %v153_v37 }
  0x84   :  { %v126_v50 = vpop.permute.xlu0 %125  ;;  %v142_v52 = vpop.permute.xlu1 %141 }
  0x85   :  { %v151_v51 = vsel %vm147_vm6, %v78_v49, %v126_v50 }
  0x86   :  { %676 = vmatmul.msk.f32.gmra.mxu3 %vm158_vm8, %v154_v44  ;;  %v156_v53 = vsel %vm152_vm7, %v151_v51, %v142_v52 }
  0x8e   :  { %677 = vmatmul.msk.f32.gmra.mxu3 %vm158_vm8, %v155_v48 }
  0x96   :  { %678 = vmatmul.msk.f32.gmra.mxu3 %vm158_vm8, %v156_v53 }
 0x101   :  { %v192_v59 = vpop.f32.mrf.mxu3 }
 0x102   :  { %v193_v60 = vadd.f32 %v747_v58, %v192_v59 }
 0x104   :  { %v921_v61 = vmax.f32 %v193_v60, 0.0 }
 0x106   :  { %335 = vrot.lane.b32.xlu2 %v921_v61, %s770_s16  ;;  %679 = vmatmul.msk.f32.vlgmr.msra.gmra.mxu1 %vm209_vm10, %v921_v61 }
 0x109   :  { %v195_v62 = vpop.f32.mrf.mxu3 }
 0x10a   :  { %v196_v63 = vadd.f32 %v747_v58, %v195_v62 }
 0x10c   :  { %v927_v0 = vmax.f32 %v196_v63, 0.0 }
 0x10e   :  { %337 = vrot.lane.b32.xlu0 %v927_v0, %s770_s16  ;;  %680 = vmatmul.msk.f32.gmra.mxu1 %vm209_vm10, %v927_v0 }
 0x111   :  { %v198_v1 = vpop.f32.mrf.mxu3 }
 0x112   :  { %v199_v2 = vadd.f32 %v747_v58, %v198_v1 }
 0x114   :  { %v933_v3 = vmax.f32 %v199_v2, 0.0 }
 0x116   :  { %339 = vrot.lane.b32.xlu1 %v933_v3, %s770_s16  ;;  %681 = vmatmul.msk.f32.gmra.mxu1 %vm209_vm10, %v933_v3 }
 0x119   :  { %v201_v4 = vpop.f32.mrf.mxu3 }
 0x11a   :  { %v202_v5 = vadd.f32 %v747_v58, %v201_v4 }
 0x11c   :  { %v939_v7 = vmax.f32 %v202_v5, 0.0 }
 0x11e   :  { %682 = vmatmul.msk.f32.gmra.mxu1 %vm209_vm10, %v939_v7  ;;  %341 = vrot.lane.b32.xlu2 %v939_v7, %s770_s16 }
 0x160   :  { %v336_v45 = vpop.permute.xlu2 %335 }
 0x180   :  { %v338_v5 = vpop.permute.xlu0 %337 }
 0x183   :  { %v239_v10 = vpop.f32.mrf.mxu1 }
 0x184   :  { %v240_v11 = vadd.f32 %v748_v8, %v239_v10 }
 0x186   :  { %v683_v12 = vmul.f32 -1.442695, %v240_v11 }
 0x188   :  { %752 = vpow2.f32 %v683_v12 }
 0x18b   :  { %v242_v13 = vpop.f32.mrf.mxu1 }
 0x18c   :  { %v243_v15 = vadd.f32 %v748_v8, %v242_v13 }
 0x18e   :  { %v753_v16 = vpop.eup %752  ;;  %v684_v17 = vmul.f32 -1.442695, %v243_v15 }
 0x18f   :  { %v263_v18 = vadd.f32 1.0, %v753_v16 }
 0x190   :  { %754 = vpow2.f32 %v684_v17 }
 0x191   :  { %756 = vrcp.f32 %v263_v18  ;;  %v278_v28 = vand.u32 2147483648, %v263_v18  ;;  %v276_v31 = vand.u32 2147483647, %v263_v18  ;;  %vm272_vm12 = vweird.f32 %v263_v18 }
 0x193   :  { %v245_v19 = vpop.f32.mrf.mxu1  ;;  %v279_v39 = vor.u32 1.1754944e-38, %v278_v28  ;;  %vm277_vm14 = vcmp.eq.f32.partialorder %v276_v31, 8.507059e+37 }
 0x194   :  { %v246_v20 = vadd.f32 %v748_v8, %v245_v19 }
 0x196   :  { %v755_v21 = vpop.eup %754  ;;  %v685_v22 = vmul.f32 -1.442695, %v246_v20 }
 0x197   :  { %v757_v23 = vpop.eup %756  ;;  %v264_v24 = vadd.f32 1.0, %v755_v21 }
 0x198   :  { %v268_v25 = vmul.f32 %v757_v23, %v263_v18  ;;  %758 = vpow2.f32 %v685_v22  ;;  %vm273_vm11 = vweird.f32 %v757_v23 }
 0x199   :  { %760 = vrcp.f32 %v264_v24  ;;  %vm274_vm13 = vmor %vm272_vm12, %vm273_vm11  ;;  %v293_v46 = vand.u32 2147483648, %v264_v24  ;;  %v291_v50 = vand.u32 2147483647, %v264_v24  ;;  %vm287_vm4 = vweird.f32 %v264_v24 }
 0x19a   :  { %v269_v26 = vsub.f32 1.0, %v268_v25 }
 0x19b   :  { %v248_v27 = vpop.f32.mrf.mxu1  ;;  %v294_v63 = vor.u32 1.1754944e-38, %v293_v46  ;;  %vm292_vm7 = vcmp.eq.f32.partialorder %v291_v50, 8.507059e+37 }
 0x19c   :  { %v249_v29 = vadd.f32 %v748_v8, %v248_v27  ;;  %v270_v30 = vmul.f32 %v757_v23, %v269_v26  ;;  %v340_v26 = vpop.permute.xlu1 %339 }
 0x19e   :  { %v759_v32 = vpop.eup %758  ;;  %v686_v33 = vmul.f32 -1.442695, %v249_v29  ;;  %v271_v34 = vadd.f32 %v757_v23, %v270_v30 }
 0x19f   :  { %v761_v35 = vpop.eup %760  ;;  %v265_v37 = vadd.f32 1.0, %v759_v32 }
 0x1a0   :  { %v283_v40 = vmul.f32 %v761_v35, %v264_v24  ;;  %762 = vpow2.f32 %v686_v33  ;;  %v275_v41 = vsel %vm274_vm13, %v757_v23, %v271_v34  ;;  %vm288_vm15 = vweird.f32 %v761_v35 }
 0x1a1   :  { %764 = vrcp.f32 %v265_v37  ;;  %v280_v42 = vsel %vm277_vm14, %v279_v39, %v275_v41  ;;  %vm289_vm6 = vmor %vm287_vm4, %vm288_vm15  ;;  %v308_v4 = vand.u32 2147483648, %v265_v37  ;;  %v306_v10 = vand.u32 2147483647, %v265_v37 }
 0x1a2   :  { %v284_v43 = vsub.f32 1.0, %v283_v40  ;;  %v331_v44 = vsub.f32 1.0, %v280_v42  ;;  %v327_v47 = vmul.f32 %v280_v42, %v921_v61  ;;  %vm302_vm11 = vweird.f32 %v265_v37 }
 0x1a3   :  { %v309_v17 = vor.u32 1.1754944e-38, %v308_v4  ;;  %vm307_vm13 = vcmp.eq.f32.partialorder %v306_v10, 8.507059e+37  ;;  %v27_v10 = vld [vmem:[%s1149_s1 + $0x80] sm:$0xff] }
 0x1a4   :  { %v347_v48 = vmul.f32 %v336_v45, %v331_v44  ;;  %v285_v49 = vmul.f32 %v761_v35, %v284_v43 }
 0x1a6   :  { %v763_v51 = vpop.eup %762  ;;  %v949_v52 = vadd.f32 %v347_v48, %v327_v47  ;;  %v286_v53 = vadd.f32 %v761_v35, %v285_v49 }
 0x1a7   :  { %v765_v58 = vpop.eup %764  ;;  %v266_v59 = vadd.f32 1.0, %v763_v51 }
 0x1a8   :  { %v298_v60 = vmul.f32 %v765_v58, %v265_v37  ;;  %383 = vrot.lane.b32.xlu0 %v949_v52, %s771_s18  ;;  %v290_v62 = vsel %vm289_vm6, %v761_v35, %v286_v53  ;;  %vm303_vm8 = vweird.f32 %v765_v58  ;;  %v367_v19 = vrot.slane %v949_v52, 1 }
 0x1a9   :  { %766 = vrcp.f32 %v266_v59  ;;  %v295_v1 = vsel %vm292_vm7, %v294_v63, %v290_v62  ;;  %vm304_vm12 = vmor %vm302_vm11, %vm303_vm8  ;;  %v355_v23 = vrot.slane %v949_v52, 7  ;;  %vm317_vm14 = vweird.f32 %v266_v59  ;;  %v33_v62 = vld [vmem:[%s1149_s1 + $0xb0] sm:$0xff]  ;;  %v32_v63 = vld [vmem:[%s1149_s1 + $0xa8] sm:$0xff] }
 0x1aa   :  { %v299_v61 = vsub.f32 1.0, %v298_v60  ;;  %v332_v2 = vsub.f32 1.0, %v295_v1  ;;  %v328_v11 = vmul.f32 %v295_v1, %v927_v0  ;;  %v321_v27 = vand.u32 2147483647, %v266_v59  ;;  %v34_v60 = vld [vmem:[%s1149_s1 + $0xb8] sm:$0xff] }
 0x1ab   :  { %v323_v28 = vand.u32 2147483648, %v266_v59  ;;  %438 = vmatpush.msra.mxu2 %v34_v60  ;;  %v30_v1 = vld [vmem:[%s1149_s1 + $0x98] sm:$0xff]  ;;  %v712_v4 = vpack.i.bf16 %v31_v14, %v32_v63 }
 0x1ac   :  { %v300_v8 = vmul.f32 %v765_v58, %v299_v61  ;;  %v348_v12 = vmul.f32 %v338_v5, %v332_v2  ;;  %vm322_vm6 = vcmp.eq.f32.partialorder %v321_v27, 8.507059e+37  ;;  %v707_v61 = vpack.i.bf16 %v33_v62, %v34_v60  ;;  %v29_v2 = vld [vmem:[%s1149_s1 + $0x90] sm:$0xff] }
 0x1ad   :  { %v324_v37 = vor.u32 1.1754944e-38, %v323_v28  ;;  %v717_v5 = vpack.i.bf16 %v29_v2, %v30_v1  ;;  %439 = vmatpush.msra.mxu2 %v33_v62 }
 0x1ae   :  { %v301_v13 = vadd.f32 %v765_v58, %v300_v8  ;;  %v352_v16 = vadd.f32 %v348_v12, %v328_v11  ;;  %v28_v8 = vld [vmem:[%s1149_s1 + $0x88] sm:$0xff]  ;;  %v26_v11 = vld [vmem:[%s1149_s1 + $0x78] sm:$0xff]  ;;  %v25_v12 = vld [vmem:[%s1149_s1 + $0x70] sm:$0xff] }
 0x1af   :  { %v767_v15 = vpop.eup %766  ;;  %440 = vmatpush.msra.mxu2 %v32_v63 }
 0x1b0   :  { %v313_v18 = vmul.f32 %v767_v15, %v266_v59  ;;  %v305_v20 = vsel %vm304_vm12, %v765_v58, %v301_v13  ;;  %385 = vrot.lane.b32.xlu2 %v352_v16, %s771_s18  ;;  %v368_v21 = vrot.slane %v352_v16, 1  ;;  %v356_v24 = vrot.slane %v352_v16, 7  ;;  %v24_v16 = vld [vmem:[%s1149_s1 + $0x68] sm:$0xff] }
 0x1b1   :  { %v310_v22 = vsel %vm307_vm13, %v309_v17, %v305_v20  ;;  %vm318_vm15 = vweird.f32 %v767_v15  ;;  %441 = vmatpush.msra.mxu2 %v31_v14  ;;  %v722_v13 = vpack.i.bf16 %v27_v10, %v28_v8  ;;  %v23_v17 = vld [vmem:[%s1149_s1 + $0x60] sm:$0xff] }
 0x1b2   :  { %v314_v0 = vsub.f32 1.0, %v313_v18  ;;  %v333_v25 = vsub.f32 1.0, %v310_v22  ;;  %v373_v29 = vsel %vm98_vm0, %v367_v19, %v368_v21  ;;  %v961_v30 = vsel %vm77_vm3, %v355_v23, %v356_v24  ;;  %vm319_vm4 = vmor %vm317_vm14, %vm318_vm15 }
 0x1b3   :  { %399 = vrot.lane.b32.xlu1 %v373_v29, %s772_s19  ;;  %v329_v32 = vmul.f32 %v310_v22, %v933_v3  ;;  %v342_v3 = vpop.permute.xlu2 %341  ;;  %442 = vmatpush.msra.mxu2 %v30_v1  ;;  %v732_v18 = vpack.i.bf16 %v23_v17, %v24_v16 }
 0x1b4   :  { %v315_v31 = vmul.f32 %v767_v15, %v314_v0  ;;  %v349_v33 = vmul.f32 %v340_v26, %v333_v25 }
 0x1b5   :  { %443 = vmatpush.msra.mxu2 %v29_v2 }
 0x1b6   :  { %v316_v34 = vadd.f32 %v767_v15, %v315_v31  ;;  %v353_v35 = vadd.f32 %v349_v33, %v329_v32 }
 0x1b7   :  { %444 = vmatpush.msra.mxu2 %v28_v8 }
 0x1b8   :  { %v357_v39 = vrot.slane %v353_v35, 7  ;;  %v369_v40 = vrot.slane %v353_v35, 1  ;;  %v320_v41 = vsel %vm319_vm4, %v767_v15, %v316_v34  ;;  %v727_v15 = vpack.i.bf16 %v25_v12, %v26_v11 }
 0x1b9   :  { %v325_v42 = vsel %vm322_vm6, %v324_v37, %v320_v41  ;;  %445 = vmatpush.msra.mxu2 %v27_v10 }
 0x1ba   :  { %v372_v43 = vsel %vm98_vm0, %v368_v21, %v369_v40  ;;  %v334_v44 = vsub.f32 1.0, %v325_v42  ;;  %v970_v45 = vsel %vm77_vm3, %v356_v24, %v357_v39  ;;  %v330_v47 = vmul.f32 %v325_v42, %v939_v7 }
 0x1bb   :  { %v376_v46 = vsel %vm50_vm1, %v372_v43, 0.0  ;;  %387 = vrot.lane.b32.xlu1 %v353_v35, %s771_s18  ;;  %446 = vmatpush.msra.mxu2 %v26_v11  ;;  %vm421_vm1 = vcmask 785408   ;;  %v365_v28 = vsel %vm55_vm9, %v970_v45, 0.0 }
 0x1bc   :  { %401 = vrot.lane.b32.xlu0 %v376_v46, %s772_s19  ;;  %v350_v48 = vmul.f32 %v342_v3, %v334_v44 }
 0x1bd   :  { %447 = vmatpush.msra.mxu2 %v25_v12 }
 0x1be   :  { %v354_v49 = vadd.f32 %v350_v48, %v330_v47 }
 0x1bf   :  { %448 = vmatpush.msra.mxu2 %v24_v16 }
 0x1c0   :  { %v370_v50 = vrot.slane %v354_v49, 1  ;;  %v358_v51 = vrot.slane %v354_v49, 7 }
 0x1c1   :  { %449 = vmatpush.msra.mxu2 %v23_v17 }
 0x1c2   :  { %v371_v52 = vsel %vm98_vm0, %v369_v40, %v370_v50  ;;  %v374_v53 = vsel %vm98_vm0, %v370_v50, %v367_v19  ;;  %v362_v58 = vsel %vm77_vm3, %v358_v51, %v355_v23  ;;  %v985_v59 = vsel %vm77_vm3, %v357_v39, %v358_v51 }
 0x1c3   :  { %403 = vrot.lane.b32.xlu2 %v371_v52, %s772_s19  ;;  %v378_v7 = vsel %vm64_vm2, %v374_v53, 0.0  ;;  %vm411_vm0 = vcmask 261120   ;;  %v363_v20 = vsel %vm45_vm5, %v362_v58, 0.0  ;;  %vm479_vm2 = vcmp.ne.s32.totalorder %v814_v9, 8  ;;  %v750_v9 = vld [vmem:[%s1149_s1 + $0xc3] ss:$0 sm:$0xff] }
 0x1c4   :  { %405 = vrot.lane.b32.xlu1 %v378_v7, %s772_s19  ;;  %389 = vrot.lane.b32.xlu0 %v354_v49, %s771_s18  ;;  %v737_v49 = vpack.i.bf16 %v901_v54, %v873_v36 }
 0x1cb   :  { %708 = vrot.lane.b32.xlu2 %v707_v61, %s770_s16 }
 0x1cc   :  { %713 = vrot.lane.b32.xlu0 %v712_v4, %s770_s16  ;;  %718 = vrot.lane.b32.xlu1 %v717_v5, %s770_s16 }
 0x1d3   :  { %723 = vrot.lane.b32.xlu2 %v722_v13, %s770_s16 }
 0x1d4   :  { %728 = vrot.lane.b32.xlu0 %v727_v15, %s770_s16  ;;  %733 = vrot.lane.b32.xlu1 %v732_v18, %s770_s16 }
 0x20a   :  { %v386_v24 = vpop.permute.xlu2 %385 }
 0x20b   :  { %v413_v0 = vsel %vm411_vm0, %v961_v30, %v386_v24 }
 0x21a   :  { %v384_v19 = vpop.permute.xlu0 %383 }
 0x21b   :  { %v412_v21 = vsel %vm411_vm0, %v363_v20, %v384_v19 }
 0x21d   :  { %v404_v31 = vpop.permute.xlu2 %403 }
 0x225   :  { %v400_v22 = vpop.permute.xlu1 %399  ;;  %v709_v7 = vpop.permute.xlu2 %708 }
 0x226   :  { %v416_v23 = vsel %vm209_vm10, %v412_v21, %v400_v22  ;;  %v710_v60 = vunpack.i.l.bf16 %v709_v7  ;;  %v711_v62 = vunpack.i.h.bf16 %v709_v7 }
 0x227   :  { %687 = vmatmul.msk.f32.vlgmr.msra.gmra.mxu2 %vm421_vm1, %v416_v23 }
 0x228   :  { %571 = vmatpush.msrb.mxu3 %v710_v60 }
 0x22a   :  { %572 = vmatpush.msrb.mxu3 %v711_v62 }
 0x22d   :  { %v388_v27 = vpop.permute.xlu1 %387  ;;  %v724_v5 = vpop.permute.xlu2 %723 }
 0x22e   :  { %v402_v25 = vpop.permute.xlu0 %401  ;;  %v414_v29 = vsel %vm411_vm0, %v365_v28, %v388_v27  ;;  %v725_v8 = vunpack.i.l.bf16 %v724_v5  ;;  %v726_v55 = vunpack.i.h.bf16 %v724_v5 }
 0x22f   :  { %v417_v26 = vsel %vm209_vm10, %v413_v0, %v402_v25  ;;  %v418_v32 = vsel %vm209_vm10, %v414_v29, %v404_v31 }
 0x230   :  { %688 = vmatmul.msk.f32.gmra.mxu2 %vm421_vm1, %v417_v26 }
 0x236   :  { %v390_v33 = vpop.permute.xlu0 %389  ;;  %v406_v34 = vpop.permute.xlu1 %405 }
 0x237   :  { %v415_v30 = vsel %vm411_vm0, %v985_v59, %v390_v33 }
 0x238   :  { %689 = vmatmul.msk.f32.gmra.mxu2 %vm421_vm1, %v418_v32  ;;  %v419_v35 = vsel %vm209_vm10, %v415_v30, %v406_v34  ;;  %v751_v30 = vld [vmem:[%s1149_s1 + $0xc4] ss:$0 sm:$0xff] }
 0x23e   :  { %v714_v63 = vpop.permute.xlu0 %713  ;;  %v719_v14 = vpop.permute.xlu1 %718 }
 0x23f   :  { %v715_v61 = vunpack.i.l.bf16 %v714_v63  ;;  %v716_v1 = vunpack.i.h.bf16 %v714_v63  ;;  %v720_v2 = vunpack.i.l.bf16 %v719_v14  ;;  %v721_v4 = vunpack.i.h.bf16 %v719_v14 }
 0x240   :  { %690 = vmatmul.msk.f32.gmra.mxu2 %vm421_vm1, %v419_v35 }
 0x241   :  { %573 = vmatpush.msrb.mxu3 %v715_v61 }
 0x243   :  { %574 = vmatpush.msrb.mxu3 %v716_v1 }
 0x245   :  { %575 = vmatpush.msrb.mxu3 %v720_v2 }
 0x246   :  { %v729_v10 = vpop.permute.xlu0 %728 }
 0x247   :  { %576 = vmatpush.msrb.mxu3 %v721_v4  ;;  %v730_v56 = vunpack.i.l.bf16 %v729_v10  ;;  %v731_v11 = vunpack.i.h.bf16 %v729_v10 }
 0x249   :  { %577 = vmatpush.msrb.mxu3 %v725_v8 }
 0x24b   :  { %578 = vmatpush.msrb.mxu3 %v726_v55 }
 0x24d   :  { %579 = vmatpush.msrb.mxu3 %v730_v56 }
 0x24f   :  { %580 = vmatpush.msrb.mxu3 %v731_v11 }
 0x2aa   :  { %v451_v37 = vpop.f32.mrf.mxu2 }
 0x2ab   :  { %v1056_v39 = vadd.f32 %v749_v38, %v451_v37 }
 0x2ad   :  { %v463_v40 = vmax.f32 %v1056_v39, 0.0 }
 0x2af   :  { %467 = vst.msk [vmem:[#allocation2] sm:$0xff] %vm411_vm0, %v463_v40 }
 0x2b3   :  { %v454_v41 = vpop.f32.mrf.mxu2 }
 0x2b4   :  { %v1062_v42 = vadd.f32 %v749_v38, %v454_v41 }
 0x2b6   :  { %v464_v43 = vmax.f32 %v1062_v42, 0.0 }
 0x2b8   :  { %468 = vst.msk [vmem:[#allocation2 + $0x8] sm:$0xff] %vm411_vm0, %v464_v43 }
 0x2bb   :  { %v457_v44 = vpop.f32.mrf.mxu2 }
 0x2bc   :  { %v1068_v45 = vadd.f32 %v749_v38, %v457_v44 }
 0x2be   :  { %v465_v3 = vmax.f32 %v1068_v45, 0.0 }
 0x2bf   :  { %v475_v46 = vld [vmem:[#allocation2 + $0x1] ss:$2 sm:$0xff]  ;;  %v471_v47 = vld [vmem:[#allocation2] ss:$2 sm:$0xff] }
 0x2c0   :  { %469 = vst.msk [vmem:[#allocation2 + $0x10] sm:$0xff] %vm411_vm0, %v465_v3  ;;  %502 = vrot.lane.b32.xlu0 %v475_v46, %s772_s19  ;;  %494 = vrot.lane.b32.xlu2 %v471_v47, %s771_s18  ;;  %v482_v58 = vrot.slane %v475_v46, 7 }
 0x2c3   :  { %v460_v48 = vpop.f32.mrf.mxu2 }
 0x2c4   :  { %v1078_v50 = vadd.f32 %v749_v38, %v460_v48 }
 0x2c6   :  { %v466_v51 = vmax.f32 %v1078_v50, 0.0 }
 0x2c8   :  { %470 = vst.msk [vmem:[#allocation2 + $0x18] sm:$0xff] %vm411_vm0, %v466_v51  ;;  %738 = vrot.lane.b32.xlu0 %v737_v49, %s770_s16 }
 0x2cf   :  { %v477_v52 = vld [vmem:[#allocation2 + $0x11] ss:$2 sm:$0xff]  ;;  %v473_v53 = vld [vmem:[#allocation2 + $0x10] ss:$2 sm:$0xff] }
 0x2d0   :  { %504 = vrot.lane.b32.xlu2 %v477_v52, %s772_s19  ;;  %v483_v59 = vrot.slane %v477_v52, 7  ;;  %496 = vrot.lane.b32.xlu1 %v473_v53, %s771_s18 }
 0x2d2   :  { %v485_v36 = vsel %vm77_vm3, %v483_v59, %v482_v58  ;;  %v484_v54 = vsel %vm77_vm3, %v482_v58, %v483_v59  ;;  %vm662_vm3 = vcmask 64512  }
 0x2d3   :  { %v490_v16 = vsel %vm45_vm5, %v485_v36, 0.0  ;;  %v491_v23 = vsel %vm479_vm2, %v484_v54, 0.0 }
 0x2d8   :  { %743 = vrot.lane.b32.xlu1 %v742_v57, %s770_s16  ;;  %v734_v57 = vpop.permute.xlu1 %733 }
 0x2d9   :  { %v735_v12 = vunpack.i.l.bf16 %v734_v57  ;;  %v736_v13 = vunpack.i.h.bf16 %v734_v57 }
 0x2db   :  { %581 = vmatpush.msrb.mxu3 %v735_v12 }
 0x2dd   :  { %582 = vmatpush.msrb.mxu3 %v736_v13 }
 0x31a   :  { %v495_v15 = vpop.permute.xlu2 %494 }
 0x31b   :  { %v508_v17 = vsel %vm411_vm0, %v490_v16, %v495_v15 }
 0x32a   :  { %v505_v0 = vpop.permute.xlu2 %504 }
 0x332   :  { %v503_v18 = vpop.permute.xlu0 %502 }
 0x333   :  { %v510_v19 = vsel %vm209_vm10, %v508_v17, %v503_v18 }
 0x334   :  { %691 = vmatmul.msk.f32.vlgmr.msrb.gmra.mxu3 %vm421_vm1, %v510_v19 }
 0x33a   :  { %v739_v20 = vpop.permute.xlu0 %738 }
 0x33b   :  { %v741_v21 = vunpack.i.h.bf16 %v739_v20  ;;  %v740_v22 = vunpack.i.l.bf16 %v739_v20 }
 0x33d   :  { %639 = vmatpush.msra.mxu0 %v740_v22 }
 0x33f   :  { %640 = vmatpush.msra.mxu0 %v741_v21 }
 0x342   :  { %v497_v24 = vpop.permute.xlu1 %496 }
 0x343   :  { %v509_v6 = vsel %vm411_vm0, %v491_v23, %v497_v24 }
 0x344   :  { %v511_v25 = vsel %vm209_vm10, %v509_v6, %v505_v0 }
 0x345   :  { %692 = vmatmul.msk.f32.gmra.mxu3 %vm421_vm1, %v511_v25 }
 0x34a   :  { %v744_v26 = vpop.permute.xlu1 %743 }
 0x34b   :  { %v746_v27 = vunpack.i.h.bf16 %v744_v26  ;;  %v745_v28 = vunpack.i.l.bf16 %v744_v26 }
 0x34d   :  { %641 = vmatpush.msra.mxu0 %v745_v28 }
 0x34f   :  { %642 = vmatpush.msra.mxu0 %v746_v27 }
 0x350   :  { %693 = vmatmul.msk.f32.vlgmr.msra.gmra.mxu0 %vm411_vm0, %v463_v40 }
 0x358   :  { %694 = vmatmul.msk.f32.gmra.mxu0 %vm411_vm0, %v464_v43 }
 0x360   :  { %695 = vmatmul.msk.f32.gmra.mxu0 %vm411_vm0, %v465_v3 }
 0x368   :  { %696 = vmatmul.msk.f32.gmra.mxu0 %vm411_vm0, %v466_v51 }
 0x3b7   :  { %v584_v29 = vpop.f32.mrf.mxu3 }
 0x3b8   :  { %v585_v31 = vadd.f32 %v750_v9, %v584_v29 }
 0x3ba   :  { %v590_v32 = vmax.f32 %v585_v31, 0.0 }
 0x3bc   :  { %697 = vmatmul.msk.f32.gmra.mxu0 %vm411_vm0, %v590_v32 }
 0x3c8   :  { %v587_v33 = vpop.f32.mrf.mxu3 }
 0x3c9   :  { %v588_v34 = vadd.f32 %v750_v9, %v587_v33 }
 0x3cb   :  { %v591_v35 = vmax.f32 %v588_v34, 0.0 }
 0x3cd   :  { %v644_v38 = vpop.f32.mrf.mxu0  ;;  %698 = vmatmul.msk.f32.gmra.mxu0 %vm411_vm0, %v591_v35 }
 0x3ce   :  { %v645_v37 = vadd.f32 %v751_v30, %v644_v38 }
 0x3d0   :  { %663 = vst.msk [vmem:[%s1150_s2] sm:$0xff] %vm662_vm3, %v645_v37 }
 0x3d5   :  { %v647_v39 = vpop.f32.mrf.mxu0 }
 0x3d6   :  { %v648_v40 = vadd.f32 %v751_v30, %v647_v39 }
 0x3d8   :  { %664 = vst.msk [vmem:[%s1150_s2 + $0x8] sm:$0xff] %vm662_vm3, %v648_v40 }
 0x3dd   :  { %v650_v41 = vpop.f32.mrf.mxu0 }
 0x3de   :  { %v651_v42 = vadd.f32 %v751_v30, %v650_v41 }
 0x3e0   :  { %699 = vst.msk [vmem:[%s1150_s2 + $0x18] sm:$0xff] %vm662_vm3, %v651_v42 }
 0x3e5   :  { %v653_v43 = vpop.f32.mrf.mxu0 }
 0x3e6   :  { %v654_v44 = vadd.f32 %v751_v30, %v653_v43 }
 0x3e8   :  { %700 = vst.msk [vmem:[%s1150_s2 + $0x20] sm:$0xff] %vm662_vm3, %v654_v44 }
 0x439   :  { %v656_v45 = vpop.f32.mrf.mxu0 }
 0x43a   :  { %v657_v3 = vadd.f32 %v751_v30, %v656_v45 }
 0x43c   :  { %665 = vst.msk [vmem:[%s1150_s2 + $0x10] sm:$0xff] %vm662_vm3, %v657_v3 }
 0x44a   :  { %v659_v46 = vpop.f32.mrf.mxu0 }
 0x44b   :  { %v660_v47 = vadd.f32 %v751_v30, %v659_v46 }
 0x44d   :  { %701 = vst.msk [vmem:[%s1150_s2 + $0x28] sm:$0xff] %vm662_vm3, %v660_v47 }

</bundles_post_ra>
